<compile_context>
chip_gen: v6e
topology: v6e:2x2x1
jax: 0.10.0
libtpu: 0.0.40
codegen_flags: <defaults>
</compile_context>

<pallas_src>
import functools
import numpy as np

import jax
import jax.numpy as jnp
from jax.experimental import pallas as pl
from jax.experimental.pallas import tpu as pltpu

_NEG_BIG = -1e30   # "-inf" stand-in that never produces 0*inf = NaN
_POS_BIG = 1e30    # mask value for padded target columns


def _cxcywh_rows_to_xyxy(bT):
    # bT: (..., 4, Np) coord-major rows (cx, cy, w, h) -> four (..., 1, Np) rows.
    cx = bT[..., 0:1, :]
    cy = bT[..., 1:2, :]
    w = bT[..., 2:3, :]
    h = bT[..., 3:4, :]
    return cx - 0.5 * w, cy - 0.5 * h, cx + 0.5 * w, cy + 0.5 * h


def _paired_giou_rows(aT, bT):
    # Diagonal of generalized_box_iou(xyxy(a), xyxy(b)) for paired boxes.
    # aT, bT: (..., 4, Np) cxcywh coord-major.  Returns (..., 1, Np).
    x1a, y1a, x2a, y2a = _cxcywh_rows_to_xyxy(aT)
    x1b, y1b, x2b, y2b = _cxcywh_rows_to_xyxy(bT)
    area_a = (x2a - x1a) * (y2a - y1a)
    area_b = (x2b - x1b) * (y2b - y1b)
    inter_w = jnp.maximum(jnp.minimum(x2a, x2b) - jnp.maximum(x1a, x1b), 0.0)
    inter_h = jnp.maximum(jnp.minimum(y2a, y2b) - jnp.maximum(y1a, y1b), 0.0)
    inter = inter_w * inter_h
    union = area_a + area_b - inter
    iou = inter / union  # parity with reference: no epsilon guard
    enc_w = jnp.maximum(x2a, x2b) - jnp.minimum(x1a, x1b)
    enc_h = jnp.maximum(y2a, y2b) - jnp.minimum(y1a, y1b)
    area_c = enc_w * enc_h
    return iou - (area_c - union) / area_c


def _matcher_kernel(w_class, w_verb, w_bbox, w_giou, n_verbs_p, n_real, fold_bbox,
                    rows_ref, boxesT_ref, scal_ref, verbs_ref, c_ref):
    rows = rows_ref[...]    # (Bblk, TM, 8)   [pred_sub | pred_obj] row-major (row tile)
    bT = boxesT_ref[...]    # (Bblk, 16, Np)  [psT; poT; tsT; toT] coord-major
    scal = scal_ref[...]    # (Bblk, 2,  Np)  [obj scores; obj soft labels]
    vb = verbs_ref[...]     # (Bblk, 2*Vp, Np)[verb logits; verb labels]

    obj_scores = scal[:, 0:1, :]            # (Bblk, 1, Np)
    obj_labels = scal[:, 1:2, :]            # (Bblk, 1, Np)
    vs = vb[:, :n_verbs_p, :]               # (Bblk, Vp, Np)
    vl = vb[:, n_verbs_p:, :]               # (Bblk, Vp, Np)

    # --- cost_class: soft-label cross entropy (scalar per image) ---
    m = jnp.max(obj_scores, axis=-1, keepdims=True)
    lse = m + jnp.log(jnp.sum(jnp.exp(obj_scores - m), axis=-1, keepdims=True))
    log_p = obj_scores - lse
    cost_class = -jnp.sum(obj_labels * log_p, axis=-1, keepdims=True)  # (Bblk,1,1)

    # --- cost_verb: BCE with logits, summed over verb classes -> (Bblk,1,Np) ---
    bce = jnp.maximum(vs, 0.0) - vs * vl + jnp.log1p(jnp.exp(-jnp.abs(vs)))
    cost_verb = jnp.sum(bce, axis=1, keepdims=True)

    # --- cost_giou: 2 - diag(GIoU_sub) - diag(GIoU_obj) -> (Bblk,1,Np) ---
    psT = bT[:, 0:4, :]
    poT = bT[:, 4:8, :]
    tsT = bT[:, 8:12, :]
    toT = bT[:, 12:16, :]
    g_sub = _paired_giou_rows(psT, tsT)
    g_obj = _paired_giou_rows(poT, toT)
    cost_giou = (1.0 - g_sub) + (1.0 - g_obj)

    # Fuse all row-broadcast terms into a single (Bblk,1,Np) vreg.
    row_term = w_class * cost_class + w_verb * cost_verb + w_giou * cost_giou

    # Mask padded target columns to +BIG so the padded output can be consumed
    # directly (no device-side post-slice needed).
    np_lanes = c_ref.shape[-1]
    if np_lanes > n_real:
        col = jax.lax.broadcasted_iota(jnp.int32, (1, 1, np_lanes), 2)
        row_term = row_term + jnp.where(col >= n_real, _POS_BIG, 0.0)

    # --- cost_bbox: L1 cdist(sub) + L1 cdist(obj) ---
    if fold_bbox:
        # w_bbox folded into pred coords on host; fold into tgt coords here
        # (one-time (4,Np) scale per image, vs per-output-element multiply).
        if w_bbox != 1.0:
            tsT_c = tsT * w_bbox
            toT_c = toT * w_bbox
        else:
            tsT_c, toT_c = tsT, toT
        # Initialize the accumulator with the fused row term (saves a final add).
        cb = row_term + jnp.abs(rows[:, :, 0:1] - tsT_c[:, 0:1, :])
        for k in range(1, 4):                                   # unrolled, tiny
            cb = cb + jnp.abs(rows[:, :, k:k + 1] - tsT_c[:, k:k + 1, :])
        for k in range(4):
            cb = cb + jnp.abs(rows[:, :, 4 + k:5 + k] - toT_c[:, k:k + 1, :])
        c_ref[...] = cb
    else:
        cb = jnp.abs(rows[:, :, 0:1] - tsT[:, 0:1, :])
        for k in range(1, 4):
            cb = cb + jnp.abs(rows[:, :, k:k + 1] - tsT[:, k:k + 1, :])
        for k in range(4):
            cb = cb + jnp.abs(rows[:, :, 4 + k:5 + k] - toT[:, k:k + 1, :])
        c_ref[...] = w_bbox * cb + row_term


def _largest_divisor_leq(n, cap):
    cap = max(1, min(n, cap))
    for d in range(cap, 0, -1):
        if n % d == 0:
            return d
    return 1


def hungarian_matcher_hoi_cost(pred_sub_boxes, pred_obj_boxes, pred_obj_scores,
                               pred_verb_scores, tgt_sub_boxes, tgt_obj_boxes,
                               tgt_obj_labels, tgt_verb_labels,
                               cost_obj_class=1.0, cost_verb_class=1.0,
                               cost_bbox=1.0, cost_giou=1.0):
    """Computes the matching cost matrix in a Pallas kernel.

    Returns a padded (B, Nr, Np) float32 array (Nr = N rounded up to 8,
    Np = N rounded up to 128).  Real entries live in [:, :N, :N]; padded
    target columns are set to +1e30 so the padded matrix can also be fed
    directly to an assignment routine.  Slice on host (numpy) — the device-side
    slice was removed on purpose to avoid re-streaming the matrix through HBM.
    """
    B, N, _ = pred_sub_boxes.shape
    V = pred_verb_scores.shape[-1]
    f32 = jnp.float32

    w_class = float(cost_obj_class)
    w_verb = float(cost_verb_class)
    w_bbox = float(cost_bbox)
    w_giou = float(cost_giou)
    fold_bbox = w_bbox > 0.0  # |w*a - w*b| == w*|a-b| only for w >= 0

    Np = max(128, pl.cdiv(N, 128) * 128)   # lane (target) axis: multiple of 128
    Nr = pl.cdiv(N, 8) * 8                 # row (prediction) axis: multiple of 8
    Vp = pl.cdiv(V, 8) * 8                 # verb classes padded to sublane multiple

    # --- block selection under a ~20 MiB double-buffered VMEM budget ----------
    budget_db = 20 * 1024 * 1024
    # per-image column-broadcast inputs (VMEM layout): boxesT(16) + scal(2->8
    # sublanes) + verbs(2*Vp), all lane width Np, f32.
    col_bytes = 4 * Np * (16 + 8 + 2 * Vp)

    # Row tile TM: cap at 512, shrink further if a single-image step would not
    # fit the budget (rows buffer is lane-padded 8 -> 128 in VMEM).
    TM = Nr if Nr <= 512 else 512
    tm_cap = (budget_db // 2 - col_bytes) // (4 * (Np + 128))
    tm_cap = max(8, (tm_cap // 8) * 8)
    TM = max(8, min(TM, tm_cap))
    RT = pl.cdiv(Nr, TM)
    Nr = RT * TM

    img_bytes = 4 * (TM * 128 + TM * Np) + col_bytes   # per image, per step
    cap_imgs = min(8, max(1, (budget_db // 2) // img_bytes))
    if RT == 1 and B >= 2:
        # keep >= 2 parallel grid steps so both v7x TensorCores get work
        cap_imgs = min(cap_imgs, max(1, B // 2))
    Bblk = _largest_divisor_leq(B, cap_imgs)            # divisor of B: no waste
    G = B // Bblk

    vmem_limit = int(min(max(2 * Bblk * img_bytes + (4 << 20), 32 << 20), 48 << 20))

    # --- pack inputs into 4 DMA streams ---------------------------------------
    ps = pred_sub_boxes.astype(f32)
    po = pred_obj_boxes.astype(f32)
    ts = tgt_sub_boxes.astype(f32)
    to = tgt_obj_boxes.astype(f32)

    def pad_cols(x, value):
        return jnp.pad(x, ((0, 0), (0, 0), (0, Np - x.shape[2])),
                       constant_values=value)

    # (B, 16, Np): pred-sub / pred-obj / tgt-sub / tgt-obj, coordinate-major.
    boxesT = jnp.concatenate(
        [jnp.swapaxes(ps, 1, 2), jnp.swapaxes(po, 1, 2),
         jnp.swapaxes(ts, 1, 2), jnp.swapaxes(to, 1, 2)], axis=1)
    boxesT = pad_cols(boxesT, 1.0)        # valid dummy boxes -> no NaN/Inf

    # (B, Nr, 8): row-major pred boxes for the (TM,1) column broadcasts.
    rows = jnp.concatenate([ps, po], axis=-1)
    if fold_bbox and w_bbox != 1.0:
        rows = rows * f32(w_bbox)         # fold w_bbox (tiny O(N*8) host-side scale)
    rows = jnp.pad(rows, ((0, 0), (0, Nr - N), (0, 0)), constant_values=1.0)

    # (B, 2, Np): obj logits (pad -1e30 so log-softmax is unchanged) + labels (pad 0).
    scores = pad_cols(pred_obj_scores.astype(f32)[:, None, :], _NEG_BIG)
    labels = pad_cols(tgt_obj_labels.astype(f32)[:, None, :], 0.0)
    scal = jnp.concatenate([scores, labels], axis=1)

    # (B, 2*Vp, Np): verb logits + labels; padded verb classes contribute 0 BCE.
    vs = pred_verb_scores.astype(f32)
    vl = tgt_verb_labels.astype(f32)
    if Vp != V:
        vs = jnp.pad(vs, ((0, 0), (0, 0), (0, Vp - V)), constant_values=-1e4)
        vl = jnp.pad(vl, ((0, 0), (0, 0), (0, Vp - V)), constant_values=0.0)
    verbs = jnp.concatenate([jnp.swapaxes(vs, 1, 2), jnp.swapaxes(vl, 1, 2)], axis=1)
    verbs = pad_cols(verbs, 0.0)

    kernel = functools.partial(_matcher_kernel, w_class, w_verb, w_bbox, w_giou,
                               Vp, N, fold_bbox)

    cost_est = pl.CostEstimate(
        flops=int(25 * B * Nr * Np),
        transcendentals=int(B * RT * (Vp + 2) * Np),
        bytes_accessed=int(4 * (B * Nr * Np + B * Nr * 8
                                + B * RT * (16 + 2 + 2 * Vp) * Np)),
    )

    c_pad = pl.pallas_call(
        kernel,
        out_shape=jax.ShapeDtypeStruct((B, Nr, Np), f32),
        grid_spec=pltpu.PrefetchScalarGridSpec(
            num_scalar_prefetch=0,
            grid=(G, RT),
            in_specs=[
                pl.BlockSpec((Bblk, TM, 8), lambda g, r: (g, r, 0)),
                pl.BlockSpec((Bblk, 16, Np), lambda g, r: (g, 0, 0)),
                pl.BlockSpec((Bblk, 2, Np), lambda g, r: (g, 0, 0)),
                pl.BlockSpec((Bblk, 2 * Vp, Np), lambda g, r: (g, 0, 0)),
            ],
            out_specs=pl.BlockSpec((Bblk, TM, Np), lambda g, r: (g, r, 0)),
        ),
        compiler_params=pltpu.CompilerParams(
            dimension_semantics=("parallel", "parallel"),
            vmem_limit_bytes=vmem_limit),
        cost_estimate=cost_est,
    )(rows, boxesT, scal, verbs)

    return c_pad


def _reference_cost(ps, po, os_, vs, ts, to, ol, vl):
    """Plain-JAX reference of the same math (for a correctness check)."""
    def per_image(ps, po, os_, vs, ts, to, ol, vl):
        logp = jax.nn.log_softmax(os_)
        cost_class = -jnp.sum(ol * logp)
        bce = jnp.maximum(vs, 0.0) - vs * vl + jnp.log1p(jnp.exp(-jnp.abs(vs)))
        cost_verb = jnp.sum(bce, axis=-1)
        cb = (jnp.sum(jnp.abs(ps[:, None, :] - ts[None, :, :]), -1)
              + jnp.sum(jnp.abs(po[:, None, :] - to[None, :, :]), -1))

        def xyxy(b):
            cx, cy, w, h = b[..., 0], b[..., 1], b[..., 2], b[..., 3]
            return jnp.stack([cx - 0.5 * w, cy - 0.5 * h,
                              cx + 0.5 * w, cy + 0.5 * h], -1)

        def giou(a, b):
            a, b = xyxy(a), xyxy(b)
            area_a = (a[..., 2] - a[..., 0]) * (a[..., 3] - a[..., 1])
            area_b = (b[..., 2] - b[..., 0]) * (b[..., 3] - b[..., 1])
            iw = jnp.maximum(jnp.minimum(a[..., 2], b[..., 2])
                             - jnp.maximum(a[..., 0], b[..., 0]), 0.0)
            ih = jnp.maximum(jnp.minimum(a[..., 3], b[..., 3])
                             - jnp.maximum(a[..., 1], b[..., 1]), 0.0)
            inter = iw * ih
            union = area_a + area_b - inter
            ew = jnp.maximum(a[..., 2], b[..., 2]) - jnp.minimum(a[..., 0], b[..., 0])
            eh = jnp.maximum(a[..., 3], b[..., 3]) - jnp.minimum(a[..., 1], b[..., 1])
            area_c = ew * eh
            return inter / union - (area_c - union) / area_c

        cost_giou = (1.0 - giou(ps, ts)) + (1.0 - giou(po, to))
        return cost_class + cost_verb[None, :] + cb + cost_giou[None, :]

    return jax.vmap(per_image)(ps, po, os_, vs, ts, to, ol, vl)


def greedy_assignment(cost):
    # TODO(synk): scipy.optimize.linear_sum_assignment (Hungarian algorithm) has
    # no clean Pallas equivalent; greedy row-wise assignment is used on host.
    cost = np.array(cost, dtype=np.float64)
    n = cost.shape[0]
    rows, cols = [], []
    taken = np.zeros(n, dtype=bool)
    for i in range(n):
        c = np.where(taken, np.inf, cost[i])
        j = int(np.argmin(c))
        taken[j] = True
        rows.append(i)
        cols.append(j)
    return np.array(rows), np.array(cols)


if __name__ == "__main__":
    B, N, V = 2, 8, 16  # batch, predictions (== targets per image), verb classes
    key = jax.random.PRNGKey(0)
    keys = jax.random.split(key, 9)

    def rand_boxes(k):
        cxcy = jax.random.uniform(k, (B, N, 2), minval=0.3, maxval=0.7)
        wh = jax.random.uniform(jax.random.fold_in(k, 1), (B, N, 2),
                                minval=0.1, maxval=0.4)
        return jnp.concatenate([cxcy, wh], axis=-1).astype(jnp.float32)

    pred_sub_boxes = rand_boxes(keys[0])
    pred_obj_boxes = rand_boxes(keys[1])
    tgt_sub_boxes = rand_boxes(keys[2])
    tgt_obj_boxes = rand_boxes(keys[3])
    pred_obj_scores = jax.random.normal(keys[4], (B, N), dtype=jnp.float32)
    pred_verb_scores = jax.random.normal(keys[5], (B, N, V), dtype=jnp.float32)
    tgt_obj_labels = jax.nn.softmax(
        jax.random.normal(keys[6], (B, N), dtype=jnp.float32), axis=-1)
    tgt_verb_labels = (jax.random.uniform(keys[7], (B, N, V)) < 0.3).astype(jnp.float32)

    C_pad = hungarian_matcher_hoi_cost(
        pred_sub_boxes, pred_obj_boxes, pred_obj_scores, pred_verb_scores,
        tgt_sub_boxes, tgt_obj_boxes, tgt_obj_labels, tgt_verb_labels)
    C_pad = jax.block_until_ready(C_pad)

    # Host-side slicing of padded output (no device HBM re-stream).
    C = np.asarray(C_pad)[:, :N, :N]

    C_ref = _reference_cost(pred_sub_boxes, pred_obj_boxes, pred_obj_scores,
                            pred_verb_scores, tgt_sub_boxes, tgt_obj_boxes,
                            tgt_obj_labels, tgt_verb_labels)
    np.testing.assert_allclose(C, np.array(C_ref), rtol=1e-5, atol=1e-5)

    all_indices = [greedy_assignment(C[b]) for b in range(B)]
    _ = all_indices  # matching indices per image

    print("KERNEL_OK")
</pallas_src>

<mosaic_0001>
module attributes {stable_mosaic.version = 11 : i64} {
  func.func @_matcher_kernel(%arg0: i32, %arg1: i32, %arg2: memref<1x8x8xf32, #tpu.memory_space<vmem>>, %arg3: memref<1x16x128xf32, #tpu.memory_space<vmem>>, %arg4: memref<1x2x128xf32, #tpu.memory_space<vmem>>, %arg5: memref<1x32x128xf32, #tpu.memory_space<vmem>>, %arg6: memref<1x8x128xf32, #tpu.memory_space<vmem>>) attributes {dimension_semantics = [#tpu.dimension_semantics<parallel>, #tpu.dimension_semantics<parallel>], iteration_bounds = array<i64: 2, 1>, scalar_prefetch = 0 : i64, scratch_operands = 0 : i64, tpu.core_type = #tpu.core_type<tc>, window_params = [{transform_indices = @transform_0, window_bounds = array<i64: 1, 8, 8>}, {transform_indices = @transform_1, window_bounds = array<i64: 1, 16, 128>}, {transform_indices = @transform_2, window_bounds = array<i64: 1, 2, 128>}, {transform_indices = @transform_3, window_bounds = array<i64: 1, 32, 128>}, {transform_indices = @transform_4, window_bounds = array<i64: 1, 8, 128>}]} {
    %c0 = arith.constant 0 : index
    %c0_0 = arith.constant 0 : index
    %c0_1 = arith.constant 0 : index
    %0 = vector.load %arg2[%c0, %c0_0, %c0_1] : memref<1x8x8xf32, #tpu.memory_space<vmem>>, vector<1x8x8xf32>
    %c0_2 = arith.constant 0 : index
    %c0_3 = arith.constant 0 : index
    %c0_4 = arith.constant 0 : index
    %1 = vector.load %arg3[%c0_2, %c0_3, %c0_4] : memref<1x16x128xf32, #tpu.memory_space<vmem>>, vector<1x16x128xf32>
    %c0_5 = arith.constant 0 : index
    %c0_6 = arith.constant 0 : index
    %c0_7 = arith.constant 0 : index
    %2 = vector.load %arg4[%c0_5, %c0_6, %c0_7] : memref<1x2x128xf32, #tpu.memory_space<vmem>>, vector<1x2x128xf32>
    %c0_8 = arith.constant 0 : index
    %c0_9 = arith.constant 0 : index
    %c0_10 = arith.constant 0 : index
    %3 = vector.load %arg5[%c0_8, %c0_9, %c0_10] : memref<1x32x128xf32, #tpu.memory_space<vmem>>, vector<1x32x128xf32>
    %4 = vector.extract_strided_slice %2 {offsets = [0, 0, 0], sizes = [1, 1, 128], strides = [1, 1, 1]} : vector<1x2x128xf32> to vector<1x1x128xf32>
    %5 = vector.extract_strided_slice %2 {offsets = [0, 1, 0], sizes = [1, 1, 128], strides = [1, 1, 1]} : vector<1x2x128xf32> to vector<1x1x128xf32>
    %6 = vector.extract_strided_slice %3 {offsets = [0, 0, 0], sizes = [1, 16, 128], strides = [1, 1, 1]} : vector<1x32x128xf32> to vector<1x16x128xf32>
    %7 = vector.extract_strided_slice %3 {offsets = [0, 16, 0], sizes = [1, 16, 128], strides = [1, 1, 1]} : vector<1x32x128xf32> to vector<1x16x128xf32>
    %cst = arith.constant dense<0xFF800000> : vector<1x1xf32>
    %8 = vector.multi_reduction <maximumf>, %4, %cst [2] : vector<1x1x128xf32> to vector<1x1xf32>
    %9 = vector.shape_cast %8 : vector<1x1xf32> to vector<1x1x1xf32>
    %10 = vector.broadcast %9 : vector<1x1x1xf32> to vector<1x1x128xf32>
    %11 = arith.subf %4, %10 : vector<1x1x128xf32>
    %12 = math.exp %11 : vector<1x1x128xf32>
    %cst_11 = arith.constant dense<0.000000e+00> : vector<1x1xf32>
    %13 = vector.multi_reduction <add>, %12, %cst_11 [2] : vector<1x1x128xf32> to vector<1x1xf32>
    %14 = vector.shape_cast %13 : vector<1x1xf32> to vector<1x1x1xf32>
    %15 = math.log %14 : vector<1x1x1xf32>
    %16 = arith.addf %9, %15 : vector<1x1x1xf32>
    %17 = vector.broadcast %16 : vector<1x1x1xf32> to vector<1x1x128xf32>
    %18 = arith.subf %4, %17 : vector<1x1x128xf32>
    %19 = arith.mulf %5, %18 : vector<1x1x128xf32>
    %cst_12 = arith.constant dense<0.000000e+00> : vector<1x1xf32>
    %20 = vector.multi_reduction <add>, %19, %cst_12 [2] : vector<1x1x128xf32> to vector<1x1xf32>
    %21 = vector.shape_cast %20 : vector<1x1xf32> to vector<1x1x1xf32>
    %cst_13 = arith.constant 0.000000e+00 : f32
    %22 = vector.broadcast %cst_13 : f32 to vector<1x1x1xf32>
    %23 = arith.subf %22, %21 : vector<1x1x1xf32>
    %cst_14 = arith.constant 0.000000e+00 : f32
    %24 = vector.broadcast %cst_14 : f32 to vector<1x16x128xf32>
    %25 = arith.maximumf %6, %24 : vector<1x16x128xf32>
    %26 = arith.mulf %6, %7 : vector<1x16x128xf32>
    %27 = arith.subf %25, %26 : vector<1x16x128xf32>
    %28 = math.absf %6 : vector<1x16x128xf32>
    %cst_15 = arith.constant 0.000000e+00 : f32
    %29 = vector.broadcast %cst_15 : f32 to vector<1x16x128xf32>
    %30 = arith.subf %29, %28 : vector<1x16x128xf32>
    %31 = math.exp %30 : vector<1x16x128xf32>
    %32 = math.log1p %31 : vector<1x16x128xf32>
    %33 = arith.addf %27, %32 : vector<1x16x128xf32>
    %cst_16 = arith.constant dense<0.000000e+00> : vector<1x128xf32>
    %34 = vector.multi_reduction <add>, %33, %cst_16 [1] : vector<1x16x128xf32> to vector<1x128xf32>
    %35 = vector.shape_cast %34 : vector<1x128xf32> to vector<1x1x128xf32>
    %36 = vector.extract_strided_slice %1 {offsets = [0, 0, 0], sizes = [1, 4, 128], strides = [1, 1, 1]} : vector<1x16x128xf32> to vector<1x4x128xf32>
    %37 = vector.extract_strided_slice %1 {offsets = [0, 4, 0], sizes = [1, 4, 128], strides = [1, 1, 1]} : vector<1x16x128xf32> to vector<1x4x128xf32>
    %38 = vector.extract_strided_slice %1 {offsets = [0, 8, 0], sizes = [1, 4, 128], strides = [1, 1, 1]} : vector<1x16x128xf32> to vector<1x4x128xf32>
    %39 = vector.extract_strided_slice %1 {offsets = [0, 12, 0], sizes = [1, 4, 128], strides = [1, 1, 1]} : vector<1x16x128xf32> to vector<1x4x128xf32>
    %40 = vector.extract_strided_slice %36 {offsets = [0, 0, 0], sizes = [1, 1, 128], strides = [1, 1, 1]} : vector<1x4x128xf32> to vector<1x1x128xf32>
    %41 = vector.extract_strided_slice %36 {offsets = [0, 1, 0], sizes = [1, 1, 128], strides = [1, 1, 1]} : vector<1x4x128xf32> to vector<1x1x128xf32>
    %42 = vector.extract_strided_slice %36 {offsets = [0, 2, 0], sizes = [1, 1, 128], strides = [1, 1, 1]} : vector<1x4x128xf32> to vector<1x1x128xf32>
    %43 = vector.extract_strided_slice %36 {offsets = [0, 3, 0], sizes = [1, 1, 128], strides = [1, 1, 1]} : vector<1x4x128xf32> to vector<1x1x128xf32>
    %cst_17 = arith.constant 5.000000e-01 : f32
    %44 = vector.broadcast %cst_17 : f32 to vector<1x1x128xf32>
    %45 = arith.mulf %44, %42 : vector<1x1x128xf32>
    %46 = arith.subf %40, %45 : vector<1x1x128xf32>
    %cst_18 = arith.constant 5.000000e-01 : f32
    %47 = vector.broadcast %cst_18 : f32 to vector<1x1x128xf32>
    %48 = arith.mulf %47, %43 : vector<1x1x128xf32>
    %49 = arith.subf %41, %48 : vector<1x1x128xf32>
    %cst_19 = arith.constant 5.000000e-01 : f32
    %50 = vector.broadcast %cst_19 : f32 to vector<1x1x128xf32>
    %51 = arith.mulf %50, %42 : vector<1x1x128xf32>
    %52 = arith.addf %40, %51 : vector<1x1x128xf32>
    %cst_20 = arith.constant 5.000000e-01 : f32
    %53 = vector.broadcast %cst_20 : f32 to vector<1x1x128xf32>
    %54 = arith.mulf %53, %43 : vector<1x1x128xf32>
    %55 = arith.addf %41, %54 : vector<1x1x128xf32>
    %56 = vector.extract_strided_slice %38 {offsets = [0, 0, 0], sizes = [1, 1, 128], strides = [1, 1, 1]} : vector<1x4x128xf32> to vector<1x1x128xf32>
    %57 = vector.extract_strided_slice %38 {offsets = [0, 1, 0], sizes = [1, 1, 128], strides = [1, 1, 1]} : vector<1x4x128xf32> to vector<1x1x128xf32>
    %58 = vector.extract_strided_slice %38 {offsets = [0, 2, 0], sizes = [1, 1, 128], strides = [1, 1, 1]} : vector<1x4x128xf32> to vector<1x1x128xf32>
    %59 = vector.extract_strided_slice %38 {offsets = [0, 3, 0], sizes = [1, 1, 128], strides = [1, 1, 1]} : vector<1x4x128xf32> to vector<1x1x128xf32>
    %cst_21 = arith.constant 5.000000e-01 : f32
    %60 = vector.broadcast %cst_21 : f32 to vector<1x1x128xf32>
    %61 = arith.mulf %60, %58 : vector<1x1x128xf32>
    %62 = arith.subf %56, %61 : vector<1x1x128xf32>
    %cst_22 = arith.constant 5.000000e-01 : f32
    %63 = vector.broadcast %cst_22 : f32 to vector<1x1x128xf32>
    %64 = arith.mulf %63, %59 : vector<1x1x128xf32>
    %65 = arith.subf %57, %64 : vector<1x1x128xf32>
    %cst_23 = arith.constant 5.000000e-01 : f32
    %66 = vector.broadcast %cst_23 : f32 to vector<1x1x128xf32>
    %67 = arith.mulf %66, %58 : vector<1x1x128xf32>
    %68 = arith.addf %56, %67 : vector<1x1x128xf32>
    %cst_24 = arith.constant 5.000000e-01 : f32
    %69 = vector.broadcast %cst_24 : f32 to vector<1x1x128xf32>
    %70 = arith.mulf %69, %59 : vector<1x1x128xf32>
    %71 = arith.addf %57, %70 : vector<1x1x128xf32>
    %72 = arith.subf %52, %46 : vector<1x1x128xf32>
    %73 = arith.subf %55, %49 : vector<1x1x128xf32>
    %74 = arith.mulf %72, %73 : vector<1x1x128xf32>
    %75 = arith.subf %68, %62 : vector<1x1x128xf32>
    %76 = arith.subf %71, %65 : vector<1x1x128xf32>
    %77 = arith.mulf %75, %76 : vector<1x1x128xf32>
    %78 = arith.minimumf %52, %68 : vector<1x1x128xf32>
    %79 = arith.maximumf %46, %62 : vector<1x1x128xf32>
    %80 = arith.subf %78, %79 : vector<1x1x128xf32>
    %cst_25 = arith.constant 0.000000e+00 : f32
    %81 = vector.broadcast %cst_25 : f32 to vector<1x1x128xf32>
    %82 = arith.maximumf %80, %81 : vector<1x1x128xf32>
    %83 = arith.minimumf %55, %71 : vector<1x1x128xf32>
    %84 = arith.maximumf %49, %65 : vector<1x1x128xf32>
    %85 = arith.subf %83, %84 : vector<1x1x128xf32>
    %cst_26 = arith.constant 0.000000e+00 : f32
    %86 = vector.broadcast %cst_26 : f32 to vector<1x1x128xf32>
    %87 = arith.maximumf %85, %86 : vector<1x1x128xf32>
    %88 = arith.mulf %82, %87 : vector<1x1x128xf32>
    %89 = arith.addf %74, %77 : vector<1x1x128xf32>
    %90 = arith.subf %89, %88 : vector<1x1x128xf32>
    %91 = arith.divf %88, %90 : vector<1x1x128xf32>
    %92 = arith.maximumf %52, %68 : vector<1x1x128xf32>
    %93 = arith.minimumf %46, %62 : vector<1x1x128xf32>
    %94 = arith.subf %92, %93 : vector<1x1x128xf32>
    %95 = arith.maximumf %55, %71 : vector<1x1x128xf32>
    %96 = arith.minimumf %49, %65 : vector<1x1x128xf32>
    %97 = arith.subf %95, %96 : vector<1x1x128xf32>
    %98 = arith.mulf %94, %97 : vector<1x1x128xf32>
    %99 = arith.subf %98, %90 : vector<1x1x128xf32>
    %100 = arith.divf %99, %98 : vector<1x1x128xf32>
    %101 = arith.subf %91, %100 : vector<1x1x128xf32>
    %102 = vector.extract_strided_slice %37 {offsets = [0, 0, 0], sizes = [1, 1, 128], strides = [1, 1, 1]} : vector<1x4x128xf32> to vector<1x1x128xf32>
    %103 = vector.extract_strided_slice %37 {offsets = [0, 1, 0], sizes = [1, 1, 128], strides = [1, 1, 1]} : vector<1x4x128xf32> to vector<1x1x128xf32>
    %104 = vector.extract_strided_slice %37 {offsets = [0, 2, 0], sizes = [1, 1, 128], strides = [1, 1, 1]} : vector<1x4x128xf32> to vector<1x1x128xf32>
    %105 = vector.extract_strided_slice %37 {offsets = [0, 3, 0], sizes = [1, 1, 128], strides = [1, 1, 1]} : vector<1x4x128xf32> to vector<1x1x128xf32>
    %cst_27 = arith.constant 5.000000e-01 : f32
    %106 = vector.broadcast %cst_27 : f32 to vector<1x1x128xf32>
    %107 = arith.mulf %106, %104 : vector<1x1x128xf32>
    %108 = arith.subf %102, %107 : vector<1x1x128xf32>
    %cst_28 = arith.constant 5.000000e-01 : f32
    %109 = vector.broadcast %cst_28 : f32 to vector<1x1x128xf32>
    %110 = arith.mulf %109, %105 : vector<1x1x128xf32>
    %111 = arith.subf %103, %110 : vector<1x1x128xf32>
    %cst_29 = arith.constant 5.000000e-01 : f32
    %112 = vector.broadcast %cst_29 : f32 to vector<1x1x128xf32>
    %113 = arith.mulf %112, %104 : vector<1x1x128xf32>
    %114 = arith.addf %102, %113 : vector<1x1x128xf32>
    %cst_30 = arith.constant 5.000000e-01 : f32
    %115 = vector.broadcast %cst_30 : f32 to vector<1x1x128xf32>
    %116 = arith.mulf %115, %105 : vector<1x1x128xf32>
    %117 = arith.addf %103, %116 : vector<1x1x128xf32>
    %118 = vector.extract_strided_slice %39 {offsets = [0, 0, 0], sizes = [1, 1, 128], strides = [1, 1, 1]} : vector<1x4x128xf32> to vector<1x1x128xf32>
    %119 = vector.extract_strided_slice %39 {offsets = [0, 1, 0], sizes = [1, 1, 128], strides = [1, 1, 1]} : vector<1x4x128xf32> to vector<1x1x128xf32>
    %120 = vector.extract_strided_slice %39 {offsets = [0, 2, 0], sizes = [1, 1, 128], strides = [1, 1, 1]} : vector<1x4x128xf32> to vector<1x1x128xf32>
    %121 = vector.extract_strided_slice %39 {offsets = [0, 3, 0], sizes = [1, 1, 128], strides = [1, 1, 1]} : vector<1x4x128xf32> to vector<1x1x128xf32>
    %cst_31 = arith.constant 5.000000e-01 : f32
    %122 = vector.broadcast %cst_31 : f32 to vector<1x1x128xf32>
    %123 = arith.mulf %122, %120 : vector<1x1x128xf32>
    %124 = arith.subf %118, %123 : vector<1x1x128xf32>
    %cst_32 = arith.constant 5.000000e-01 : f32
    %125 = vector.broadcast %cst_32 : f32 to vector<1x1x128xf32>
    %126 = arith.mulf %125, %121 : vector<1x1x128xf32>
    %127 = arith.subf %119, %126 : vector<1x1x128xf32>
    %cst_33 = arith.constant 5.000000e-01 : f32
    %128 = vector.broadcast %cst_33 : f32 to vector<1x1x128xf32>
    %129 = arith.mulf %128, %120 : vector<1x1x128xf32>
    %130 = arith.addf %118, %129 : vector<1x1x128xf32>
    %cst_34 = arith.constant 5.000000e-01 : f32
    %131 = vector.broadcast %cst_34 : f32 to vector<1x1x128xf32>
    %132 = arith.mulf %131, %121 : vector<1x1x128xf32>
    %133 = arith.addf %119, %132 : vector<1x1x128xf32>
    %134 = arith.subf %114, %108 : vector<1x1x128xf32>
    %135 = arith.subf %117, %111 : vector<1x1x128xf32>
    %136 = arith.mulf %134, %135 : vector<1x1x128xf32>
    %137 = arith.subf %130, %124 : vector<1x1x128xf32>
    %138 = arith.subf %133, %127 : vector<1x1x128xf32>
    %139 = arith.mulf %137, %138 : vector<1x1x128xf32>
    %140 = arith.minimumf %114, %130 : vector<1x1x128xf32>
    %141 = arith.maximumf %108, %124 : vector<1x1x128xf32>
    %142 = arith.subf %140, %141 : vector<1x1x128xf32>
    %cst_35 = arith.constant 0.000000e+00 : f32
    %143 = vector.broadcast %cst_35 : f32 to vector<1x1x128xf32>
    %144 = arith.maximumf %142, %143 : vector<1x1x128xf32>
    %145 = arith.minimumf %117, %133 : vector<1x1x128xf32>
    %146 = arith.maximumf %111, %127 : vector<1x1x128xf32>
    %147 = arith.subf %145, %146 : vector<1x1x128xf32>
    %cst_36 = arith.constant 0.000000e+00 : f32
    %148 = vector.broadcast %cst_36 : f32 to vector<1x1x128xf32>
    %149 = arith.maximumf %147, %148 : vector<1x1x128xf32>
    %150 = arith.mulf %144, %149 : vector<1x1x128xf32>
    %151 = arith.addf %136, %139 : vector<1x1x128xf32>
    %152 = arith.subf %151, %150 : vector<1x1x128xf32>
    %153 = arith.divf %150, %152 : vector<1x1x128xf32>
    %154 = arith.maximumf %114, %130 : vector<1x1x128xf32>
    %155 = arith.minimumf %108, %124 : vector<1x1x128xf32>
    %156 = arith.subf %154, %155 : vector<1x1x128xf32>
    %157 = arith.maximumf %117, %133 : vector<1x1x128xf32>
    %158 = arith.minimumf %111, %127 : vector<1x1x128xf32>
    %159 = arith.subf %157, %158 : vector<1x1x128xf32>
    %160 = arith.mulf %156, %159 : vector<1x1x128xf32>
    %161 = arith.subf %160, %152 : vector<1x1x128xf32>
    %162 = arith.divf %161, %160 : vector<1x1x128xf32>
    %163 = arith.subf %153, %162 : vector<1x1x128xf32>
    %cst_37 = arith.constant 1.000000e+00 : f32
    %164 = vector.broadcast %cst_37 : f32 to vector<1x1x128xf32>
    %165 = arith.subf %164, %101 : vector<1x1x128xf32>
    %cst_38 = arith.constant 1.000000e+00 : f32
    %166 = vector.broadcast %cst_38 : f32 to vector<1x1x128xf32>
    %167 = arith.subf %166, %163 : vector<1x1x128xf32>
    %168 = arith.addf %165, %167 : vector<1x1x128xf32>
    %cst_39 = arith.constant 1.000000e+00 : f32
    %169 = vector.broadcast %cst_39 : f32 to vector<1x1x1xf32>
    %170 = arith.mulf %169, %23 : vector<1x1x1xf32>
    %cst_40 = arith.constant 1.000000e+00 : f32
    %171 = vector.broadcast %cst_40 : f32 to vector<1x1x128xf32>
    %172 = arith.mulf %171, %35 : vector<1x1x128xf32>
    %173 = vector.broadcast %170 : vector<1x1x1xf32> to vector<1x1x128xf32>
    %174 = arith.addf %173, %172 : vector<1x1x128xf32>
    %cst_41 = arith.constant 1.000000e+00 : f32
    %175 = vector.broadcast %cst_41 : f32 to vector<1x1x128xf32>
    %176 = arith.mulf %175, %168 : vector<1x1x128xf32>
    %177 = arith.addf %174, %176 : vector<1x1x128xf32>
    %178 = tpu.iota {dimensions = array<i32: 2>} : vector<1x1x128xi32>
    %c8_i32 = arith.constant 8 : i32
    %179 = vector.broadcast %c8_i32 : i32 to vector<1x1x128xi32>
    %180 = arith.cmpi sge, %178, %179 : vector<1x1x128xi32>
    %cst_42 = arith.constant 1.000000e+30 : f32
    %cst_43 = arith.constant 0.000000e+00 : f32
    %181 = vector.broadcast %cst_42 : f32 to vector<1x1x128xf32>
    %182 = vector.broadcast %cst_43 : f32 to vector<1x1x128xf32>
    %183 = arith.select %180, %181, %182 : vector<1x1x128xi1>, vector<1x1x128xf32>
    %184 = arith.addf %177, %183 : vector<1x1x128xf32>
    %185 = vector.extract_strided_slice %0 {offsets = [0, 0, 0], sizes = [1, 8, 1], strides = [1, 1, 1]} : vector<1x8x8xf32> to vector<1x8x1xf32>
    %186 = vector.extract_strided_slice %38 {offsets = [0, 0, 0], sizes = [1, 1, 128], strides = [1, 1, 1]} : vector<1x4x128xf32> to vector<1x1x128xf32>
    %187 = vector.broadcast %185 : vector<1x8x1xf32> to vector<1x8x128xf32>
    %188 = vector.broadcast %186 : vector<1x1x128xf32> to vector<1x8x128xf32>
    %189 = arith.subf %187, %188 : vector<1x8x128xf32>
    %190 = math.absf %189 : vector<1x8x128xf32>
    %191 = vector.broadcast %184 : vector<1x1x128xf32> to vector<1x8x128xf32>
    %192 = arith.addf %191, %190 : vector<1x8x128xf32>
    %193 = vector.extract_strided_slice %0 {offsets = [0, 0, 1], sizes = [1, 8, 1], strides = [1, 1, 1]} : vector<1x8x8xf32> to vector<1x8x1xf32>
    %194 = vector.extract_strided_slice %38 {offsets = [0, 1, 0], sizes = [1, 1, 128], strides = [1, 1, 1]} : vector<1x4x128xf32> to vector<1x1x128xf32>
    %195 = vector.broadcast %193 : vector<1x8x1xf32> to vector<1x8x128xf32>
    %196 = vector.broadcast %194 : vector<1x1x128xf32> to vector<1x8x128xf32>
    %197 = arith.subf %195, %196 : vector<1x8x128xf32>
    %198 = math.absf %197 : vector<1x8x128xf32>
    %199 = arith.addf %192, %198 : vector<1x8x128xf32>
    %200 = vector.extract_strided_slice %0 {offsets = [0, 0, 2], sizes = [1, 8, 1], strides = [1, 1, 1]} : vector<1x8x8xf32> to vector<1x8x1xf32>
    %201 = vector.extract_strided_slice %38 {offsets = [0, 2, 0], sizes = [1, 1, 128], strides = [1, 1, 1]} : vector<1x4x128xf32> to vector<1x1x128xf32>
    %202 = vector.broadcast %200 : vector<1x8x1xf32> to vector<1x8x128xf32>
    %203 = vector.broadcast %201 : vector<1x1x128xf32> to vector<1x8x128xf32>
    %204 = arith.subf %202, %203 : vector<1x8x128xf32>
    %205 = math.absf %204 : vector<1x8x128xf32>
    %206 = arith.addf %199, %205 : vector<1x8x128xf32>
    %207 = vector.extract_strided_slice %0 {offsets = [0, 0, 3], sizes = [1, 8, 1], strides = [1, 1, 1]} : vector<1x8x8xf32> to vector<1x8x1xf32>
    %208 = vector.extract_strided_slice %38 {offsets = [0, 3, 0], sizes = [1, 1, 128], strides = [1, 1, 1]} : vector<1x4x128xf32> to vector<1x1x128xf32>
    %209 = vector.broadcast %207 : vector<1x8x1xf32> to vector<1x8x128xf32>
    %210 = vector.broadcast %208 : vector<1x1x128xf32> to vector<1x8x128xf32>
    %211 = arith.subf %209, %210 : vector<1x8x128xf32>
    %212 = math.absf %211 : vector<1x8x128xf32>
    %213 = arith.addf %206, %212 : vector<1x8x128xf32>
    %214 = vector.extract_strided_slice %0 {offsets = [0, 0, 4], sizes = [1, 8, 1], strides = [1, 1, 1]} : vector<1x8x8xf32> to vector<1x8x1xf32>
    %215 = vector.extract_strided_slice %39 {offsets = [0, 0, 0], sizes = [1, 1, 128], strides = [1, 1, 1]} : vector<1x4x128xf32> to vector<1x1x128xf32>
    %216 = vector.broadcast %214 : vector<1x8x1xf32> to vector<1x8x128xf32>
    %217 = vector.broadcast %215 : vector<1x1x128xf32> to vector<1x8x128xf32>
    %218 = arith.subf %216, %217 : vector<1x8x128xf32>
    %219 = math.absf %218 : vector<1x8x128xf32>
    %220 = arith.addf %213, %219 : vector<1x8x128xf32>
    %221 = vector.extract_strided_slice %0 {offsets = [0, 0, 5], sizes = [1, 8, 1], strides = [1, 1, 1]} : vector<1x8x8xf32> to vector<1x8x1xf32>
    %222 = vector.extract_strided_slice %39 {offsets = [0, 1, 0], sizes = [1, 1, 128], strides = [1, 1, 1]} : vector<1x4x128xf32> to vector<1x1x128xf32>
    %223 = vector.broadcast %221 : vector<1x8x1xf32> to vector<1x8x128xf32>
    %224 = vector.broadcast %222 : vector<1x1x128xf32> to vector<1x8x128xf32>
    %225 = arith.subf %223, %224 : vector<1x8x128xf32>
    %226 = math.absf %225 : vector<1x8x128xf32>
    %227 = arith.addf %220, %226 : vector<1x8x128xf32>
    %228 = vector.extract_strided_slice %0 {offsets = [0, 0, 6], sizes = [1, 8, 1], strides = [1, 1, 1]} : vector<1x8x8xf32> to vector<1x8x1xf32>
    %229 = vector.extract_strided_slice %39 {offsets = [0, 2, 0], sizes = [1, 1, 128], strides = [1, 1, 1]} : vector<1x4x128xf32> to vector<1x1x128xf32>
    %230 = vector.broadcast %228 : vector<1x8x1xf32> to vector<1x8x128xf32>
    %231 = vector.broadcast %229 : vector<1x1x128xf32> to vector<1x8x128xf32>
    %232 = arith.subf %230, %231 : vector<1x8x128xf32>
    %233 = math.absf %232 : vector<1x8x128xf32>
    %234 = arith.addf %227, %233 : vector<1x8x128xf32>
    %235 = vector.extract_strided_slice %0 {offsets = [0, 0, 7], sizes = [1, 8, 1], strides = [1, 1, 1]} : vector<1x8x8xf32> to vector<1x8x1xf32>
    %236 = vector.extract_strided_slice %39 {offsets = [0, 3, 0], sizes = [1, 1, 128], strides = [1, 1, 1]} : vector<1x4x128xf32> to vector<1x1x128xf32>
    %237 = vector.broadcast %235 : vector<1x8x1xf32> to vector<1x8x128xf32>
    %238 = vector.broadcast %236 : vector<1x1x128xf32> to vector<1x8x128xf32>
    %239 = arith.subf %237, %238 : vector<1x8x128xf32>
    %240 = math.absf %239 : vector<1x8x128xf32>
    %241 = arith.addf %234, %240 : vector<1x8x128xf32>
    %c0_44 = arith.constant 0 : index
    %c0_45 = arith.constant 0 : index
    %c0_46 = arith.constant 0 : index
    %242 = vector.load %arg6[%c0_44, %c0_45, %c0_46] : memref<1x8x128xf32, #tpu.memory_space<vmem>>, vector<1x8x128xf32>
    tpu.vector_store %arg6[%c0_44, %c0_45, %c0_46], %241 {strides = array<i32>} : memref<1x8x128xf32, #tpu.memory_space<vmem>>, vector<1x8x128xf32>,
    return
  }
  func.func @transform_0(%arg0: i32, %arg1: i32) -> (i32, i32, i32) {
    %c0_i32 = arith.constant 0 : i32
    %c0_i32_0 = arith.constant 0 : i32
    return %arg0, %arg1, %c0_i32 : i32, i32, i32
  }
  func.func @transform_1(%arg0: i32, %arg1: i32) -> (i32, i32, i32) {
    %c0_i32 = arith.constant 0 : i32
    %c0_i32_0 = arith.constant 0 : i32
    %c0_i32_1 = arith.constant 0 : i32
    return %arg0, %c0_i32, %c0_i32_0 : i32, i32, i32
  }
  func.func @transform_2(%arg0: i32, %arg1: i32) -> (i32, i32, i32) {
    %c0_i32 = arith.constant 0 : i32
    %c0_i32_0 = arith.constant 0 : i32
    %c0_i32_1 = arith.constant 0 : i32
    return %arg0, %c0_i32, %c0_i32_0 : i32, i32, i32
  }
  func.func @transform_3(%arg0: i32, %arg1: i32) -> (i32, i32, i32) {
    %c0_i32 = arith.constant 0 : i32
    %c0_i32_0 = arith.constant 0 : i32
    %c0_i32_1 = arith.constant 0 : i32
    return %arg0, %c0_i32, %c0_i32_0 : i32, i32, i32
  }
  func.func @transform_4(%arg0: i32, %arg1: i32) -> (i32, i32, i32) {
    %c0_i32 = arith.constant 0 : i32
    %c0_i32_0 = arith.constant 0 : i32
    return %arg0, %arg1, %c0_i32 : i32, i32, i32
  }
}

</mosaic_0001>

<bundles_post_ra>
// kernel: tpu_custom_call.1
= control target key start
LH: loop header
LB: loop body
LE: loop exit
PB: predicated region body
PF: predicated region fallthrough
CT: control target
= control target key end

     0   :  { %s1354_s0 = inlined_call_operand.hbm [shape: f32[2,8,8], index: 0, kind: input, shape index: {}]   ;;  %s1355_s1 = inlined_call_operand.hbm [shape: f32[2,16,128], index: 1, kind: input, shape index: {}]   ;;  %s1356_s2 = inlined_call_operand.hbm [shape: f32[2,2,128], index: 2, kind: input, shape index: {}]   ;;  %s1357_s3 = inlined_call_operand.hbm [shape: f32[2,32,128], index: 3, kind: input, shape index: {}]   ;;  %s1358_s4 = inlined_call_operand.hbm [shape: f32[2,8,128], index: 4, kind: output, shape index: {}]  }
   0x1   :  { %1363 = sst [smem:[#allocation18_spill]] %s1355_s1 }
   0x2   :  { %9 = vsyncpa [#allocation3], 0 }
   0x3   :  { %11 = vsyncpa [#allocation3 + $0x1], 0 }
   0x4   :  { %12 = vsyncpa [#allocation6], 0 }
   0x5   :  { %14 = vsyncpa [#allocation6 + $0x1], 0 }
   0x6   :  { %15 = vsyncpa [#allocation9], 0 }
   0x7   :  { %17 = vsyncpa [#allocation9 + $0x1], 0 }
   0x8   :  { %18 = vsyncpa [#allocation4], 0 }
   0x9   :  { %20 = vsyncpa [#allocation4 + $0x1], 0  ;;  %s1113_s15 = smov 0   ;;  %s1115_s16 = smov 0  }
   0xa   :  { %s1117_s17 = smov 0   ;;  %s1119_s18 = smov 0  }
   0xb   :  { %s1121_s19 = smov 0   ;;  %s1123_s20 = smov 0  }
   0xc LB: > { %1364 = sst [smem:[#allocation15_spill]] %s1058_s17  ;;  %s1144_s21 = sadd.s32 4294967295, %s1070_s20   ;;  %s1070_s20 = sphi %s1123_s20, %s26_s20   ;;  %s1066_s19 = sphi %s1121_s19, %s1383_s19   ;;  %s1062_s18 = sphi %s1119_s18, %s1382_s18   ;;  %s1058_s17 = sphi %s1117_s17, %s1378_s17   ;;  %s1054_s16 = sphi %s1115_s16, %s1381_s16   ;;  %s1050_s15 = sphi %s1113_s15, %s1380_s15  }
   0xd   : > { %s732_s22 = sadd.s32 4294967294, %s1070_s20   ;;  %s38_s23 = sadd.s32 1, %s1066_s19 }
   0xe   : > { %s47_s24 = sadd.s32 1, %s1058_s17  ;;  %p40_p0 = scmp.ge.s32.totalorder %s38_s23, 2 }
   0xf   : > { %p54_p1 = scmp.ne.s32.totalorder %s1058_s17, %s1054_s16  ;;  %p55_p2 = scmp.eq.s32.totalorder %s1070_s20, 0 }
  0x10   : > { %p60_p3 = scmp.ne.s32.totalorder %s1054_s16, %s1050_s15  ;;  %s1385_s23 = smov (%p40_p0, %s38_s23), 0 }
  0x11   : > { %1365 = sst [smem:[#allocation16_spill]] %s1385_s23  ;;  %p1156_p4 = por %p55_p2, %p54_p1 }
  0x12   : > { %p61_p5 = scmp.eq.s32.totalorder %s1144_s21, 0  ;;  %s42_s26 = ssub.s32 %s1066_s19, %s1385_s23 }
  0x13   : > { %p164_p6 = scmp.eq.s32.totalorder %s1144_s21, 1  ;;  %p45_p7 = scmp.eq.s32.totalorder %s42_s26, 0 }
  0x14   : > { %p1164_p8 = por %p61_p5, %p60_p3  ;;  %p170_p10 = scmp.eq.s32.totalorder %s732_s22, 1 }
  0x15   : > { %p1168_p9 = por %p164_p6, %p54_p1  ;;  %p784_p13 = scmp.lt.s32.totalorder %s1070_s20, 2 }
  0x16   : > { %s1173_s29 = scalar_select %p45_p7, %s1058_s17, %s47_s24  }
  0x17   : > { %p1175_p11 = por %p170_p10, %p60_p3  ;;  %s1182_s5 = sand.u32 1, %s1058_s17  }
  0x18   : > { %1369 = sst [smem:[#allocation17_spill]] %s1173_s29  ;;  %s209_s6 = sand.u32 1, %s1070_s20  }
  0x19   : > { %s737_s7 = sshll.u32 %s1182_s5, 4  ;;  %p1188_p0 = pnand %p784_p13, %p1156_p4 }
  0x1a   : > { %s755_s9 = sshll.u32 %s1066_s19, 8  ;;  %s1372_s1 = sld [smem:[#allocation18_spill]] }
  0x1b   : > { %s213_s13 = scalar_lea.vmem [#allocation5], %s737_s7  ;;  %s1196_s22 = scalar_lea.sflag [#allocation6], %s209_s6 }
  0x1c   : > { %s220_s14 = sshll.u32 %s213_s13, 4  ;;  %p872_p1 = pneg %p1188_p0  ;;  %s221_s14 = int_to_ptr.vmem [resolvable:$true] %s220_s14 }
  0x1d   : > { %s883_s24 = scalar_lea.vmem %s221_s14, 256  ;;  %s1072_s25 = smov [#allocation5]  }
  0x1e   : > { %p884_p2 = scmp.ne.s32.totalorder %s221_s14, %s883_s24  ;;  %s888_s26 = sshll.u32 %s1072_s25, 4  ;;  %s889_s26 = int_to_ptr.vmem [resolvable:$false] %s888_s26 }
  0x1f   : > { %s890_s23 = scalar_lea.vmem %s889_s26, 512  ;;  %p891_p5 = scmp.lt.s32.totalorder %s221_s14, %s889_s26 }
  0x20   : > { %s219_s12 = scalar_lea.hbm %s1372_s1, %s755_s9  ;;  %p886_p3 = pnand %p884_p2, %p872_p1 }
  0x21   : > { %p892_p6 = scmp.lt.s32.totalorder %s890_s23, %s883_s24 }
  0x22   : > { %p887_p4 = pneg %p886_p3 }
  0x23   : > { %p893_p7 = por %p892_p6, %p891_p5 }
  0x25   : > { %p894_p10 = pnand %p893_p7, %p887_p4 }
  0x27   : > { %897 = shalt.err (!%p894_p10)
}
  0x28   : > { %s1361_s7 = smov 128   ;;  %s1362_s6 = smov 8  }
  0x29   : > { %773 = dma.hbm_to_vmem [thread:$0]  (!%p1188_p0), %s219_s12, 256, %s221_s14, %s1196_s22, %s1361_s7, %s1361_s7, %s1362_s6  }
  0x2a   : > { %p745_p13 = scmp.ge.s32.totalorder %s1070_s20, 1  ;;  %p267_p2 = scmp.lt.s32.totalorder %s1070_s20, 3 }
  0x2b   : > { %s735_s9 = sshll.u32 %s1182_s5, 3  ;;  %s736_s10 = sshll.u32 %s1066_s19, 7 }
  0x2c   : > { %p1211_p3 = pnand %p745_p13, %p267_p2  ;;  %s200_s24 = scalar_lea.hbm %s1354_s0, %s736_s10 }
  0x2d   : > { %s194_s25 = scalar_lea.vmem [#allocation2], %s735_s9  ;;  %s740_s1 = sshll.u32 %s1182_s5, 1 }
  0x2e   : > { %s202_s26 = sshll.u32 %s194_s25, 4  ;;  %s191_s29 = scalar_lea.sflag [#allocation3], %s1182_s5  ;;  %s203_s26 = int_to_ptr.vmem [resolvable:$true] %s202_s26 }
  0x2f   : > { %s911_s17 = scalar_lea.vmem %s203_s26, 128  ;;  %s1075_s12 = smov [#allocation2]  }
  0x30   : > { %p912_p4 = scmp.ne.s32.totalorder %s203_s26, %s911_s17  ;;  %s916_s14 = sshll.u32 %s1075_s12, 4  ;;  %s917_s14 = int_to_ptr.vmem [resolvable:$false] %s916_s14 }
  0x31   : > { %s918_s7 = scalar_lea.vmem %s917_s14, 256  ;;  %p919_p7 = scmp.lt.s32.totalorder %s203_s26, %s917_s14 }
  0x32   : > { %p914_p5 = pnand %p912_p4, %p872_p1  ;;  %p920_p10 = scmp.lt.s32.totalorder %s918_s7, %s911_s17 }
  0x34   : > { %p915_p6 = pneg %p914_p5  ;;  %p921_p13 = por %p920_p10, %p919_p7 }
  0x36   : > { %p922_p2 = pnand %p921_p13, %p915_p6 }
  0x38   : > { %925 = shalt.err (!%p922_p2)
}
  0x39   : > { %770 = dma.hbm_to_vmem [thread:$0]  (!%p1188_p0), %s200_s24, 128, %s203_s26, %s191_s29  }
  0x3a   : > { %s741_s9 = sshll.u32 %s1066_s19, 5  ;;  %s234_s10 = scalar_lea.vmem [#allocation7], %s740_s1 }
  0x3b   : > { %s241_s11 = sshll.u32 %s234_s10, 4  ;;  %s239_s6 = scalar_lea.hbm %s1356_s2, %s741_s9  ;;  %s242_s11 = int_to_ptr.vmem [resolvable:$true] %s241_s11 }
  0x3c   : > { %s939_s12 = scalar_lea.vmem %s242_s11, 32  ;;  %s1076_s17 = smov [#allocation7]  }
  0x3d   : > { %p940_p4 = scmp.ne.s32.totalorder %s242_s11, %s939_s12  ;;  %s944_s7 = sshll.u32 %s1076_s17, 4  ;;  %s945_s7 = int_to_ptr.vmem [resolvable:$false] %s944_s7 }
  0x3e   : > { %s946_s14 = scalar_lea.vmem %s945_s7, 64  ;;  %p947_p7 = scmp.lt.s32.totalorder %s242_s11, %s945_s7 }
  0x3f   : > { %p942_p5 = pnand %p940_p4, %p872_p1  ;;  %p948_p10 = scmp.lt.s32.totalorder %s946_s14, %s939_s12 }
  0x41   : > { %p943_p6 = pneg %p942_p5  ;;  %p949_p13 = por %p948_p10, %p947_p7 }
  0x43   : > { %p950_p2 = pnand %p949_p13, %p943_p6 }
  0x45   : > { %953 = shalt.err (!%p950_p2)
}
  0x46   : > { %776 = dma.hbm_to_vmem [thread:$0]  (!%p1188_p0), %s239_s6, 32, %s242_s11, %s1196_s22  }
  0x47   : > { %s742_s1 = sshll.u32 %s1182_s5, 5  ;;  %s756_s29 = sshll.u32 %s1066_s19, 9 }
  0x48   : > { %s258_s9 = scalar_lea.hbm %s1357_s3, %s756_s29  ;;  %s252_s10 = scalar_lea.vmem [#allocation8], %s742_s1 }
  0x49   : > { %s259_s13 = sshll.u32 %s252_s10, 4  ;;  %s249_s25 = scalar_lea.sflag [#allocation9], %s1182_s5  ;;  %s260_s13 = int_to_ptr.vmem [resolvable:$true] %s259_s13 }
  0x4a   : > { %s967_s12 = scalar_lea.vmem %s260_s13, 512  ;;  %s1077_s17 = smov [#allocation8]  }
  0x4b   : > { %p968_p4 = scmp.ne.s32.totalorder %s260_s13, %s967_s12  ;;  %s972_s7 = sshll.u32 %s1077_s17, 4  ;;  %s973_s7 = int_to_ptr.vmem [resolvable:$false] %s972_s7 }
  0x4c   : > { %s974_s22 = scalar_lea.vmem %s973_s7, 1024  ;;  %p975_p7 = scmp.lt.s32.totalorder %s260_s13, %s973_s7 }
  0x4d   : > { %p970_p5 = pnand %p968_p4, %p872_p1  ;;  %p976_p10 = scmp.lt.s32.totalorder %s974_s22, %s967_s12 }
  0x4f   : > { %p971_p6 = pneg %p970_p5  ;;  %p977_p13 = por %p976_p10, %p975_p7 }
  0x51   : > { %p978_p2 = pnand %p977_p13, %p971_p6 }
  0x53   : > { %981 = shalt.err (!%p978_p2)
}
  0x54   : > { %s1374_s6 = smov 8   ;;  %s1375_s11 = smov 128  }
  0x55   : > { %779 = dma.hbm_to_vmem [thread:$0]  (!%p1188_p0), %s258_s9, 512, %s260_s13, %s249_s25, %s1375_s11, %s1375_s11, %s1374_s6  }
  0x56   : > { %271 = sbr.rel (%p1211_p3) target bundleno = 598 (0x256), region = 36  ;;  %s1254_s5 = sand.u32 (!%p1211_p3), 1, %s1054_s16  }
  0x57   : > { %s746_s14 = sshll.u32 (!%p1211_p3), %s1254_s5, 3  ;;  %s274_s1 = scalar_lea.sflag (!%p1211_p3), [#allocation3], %s1254_s5 }
  0x58   : > { %s277_s29 = scalar_lea.vmem (!%p1211_p3), [#allocation2], %s746_s14 }
  0x5b   : > { %1033 = dma.done.wait (%p1164_p8), %s274_s1, 128  }
  0x5c   : > { %1035 = vsyncadd (%p1164_p8), %s274_s1, 4294967168  ;;  %s282_s8 = sand.u32 1, %s1144_s21   ;;  %s747_s23 = sshll.u32 %s1254_s5, 4 }
  0x5d   : > { %s283_s24 = scalar_lea.sflag [#allocation6], %s282_s8  ;;  %s1266_s26 = scalar_lea.vmem [#allocation5], %s747_s23 }
  0x5e   : > { %1037 = dma.done.wait (%p1164_p8), %s283_s24, 288  }
  0x5f   : > { %1039 = vsyncadd (%p1164_p8), %s283_s24, 4294967008  ;;  %s748_s9 = sshll.u32 %s1254_s5, 1  ;;  %s749_s10 = sshll.u32 %s1254_s5, 5 }
  0x60   : > { %s295_s13 = scalar_lea.vmem [#allocation7], %s748_s9  ;;  %s301_s25 = scalar_lea.sflag [#allocation9], %s1254_s5 }
  0x61   : > { %s1275_s12 = scalar_lea.vmem [#allocation8], %s749_s10 }
  0x62   : > { %1041 = dma.done.wait (%p1164_p8), %s301_s25, 512  }
  0x63   : > { %1043 = vsyncadd (%p1164_p8), %s301_s25, 4294966784  ;;  %vm352_vm0 = vcmask 1040384   ;;  %v347_v0 = vld [vmem:[%s295_s13] sm:$0x3]  ;;  %v344_v2 = vld [vmem:[%s277_s29] sm:$0xff]  ;;  %v1078_v3 = vmov 0  }
  0x64   : > { %v353_v1 = vsel %vm352_vm0, %v347_v0, -inf  ;;  %845 = vset.pattern.permute.xlu1 %v1078_v3  ;;  %v1079_v4 = vmov 2   ;;  %v1080_v5 = vmov 3   ;;  %v1081_v6 = vmov 4   ;;  %v1284_v24 = vld [vmem:[%s1275_s12] sm:$0xff]  ;;  %v1287_v25 = vld [vmem:[%s1275_s12 + $0x8] sm:$0xff] }
  0x65   : > { %354 = vmax.xlane.f32.xlu0 %v353_v1  ;;  %478 = vperm.xlu1 %845, %v344_v2   ;;  %v1082_v7 = vmov 5   ;;  %v1083_v8 = vmov 6   ;;  %v1084_v14 = vmov 1   ;;  %v1085_v15 = vmov 7   ;;  %v345_v32 = vld [vmem:[%s1266_s26] sm:$0xff]  ;;  %v1293_v33 = vld [vmem:[%s1266_s26 + $0x8] sm:$0xff] }
  0x66   : > { %846 = vset.pattern.permute.xlu0 %v1084_v14  ;;  %vm370_vm1 = vcmask 1041409   ;;  %v381_v26 = vand.u32 2147483647, %v1284_v24  ;;  %v382_v27 = vand.u32 2147483647, %v1287_v25  ;;  %v416_v34 = vmul.f32 0.5, %v345_v32 }
  0x67   : > { %v422_v35 = vmul.f32 0.5, %v1293_v33  ;;  %v350_v3 = vld [vmem:[%s1275_s12 + $0x10] sm:$0xff]  ;;  %s752_s21 = sshll.u32 %s1062_s18, 7  ;;  %s343_s27 = scalar_lea.vmem [#allocation10], %s746_s14 }
  0x68   : > { %v383_v28 = vsub.f32 0.0, %v381_v26  ;;  %v384_v29 = vsub.f32 0.0, %v382_v27  ;;  %v418_v36 = vrot.slane %v416_v34, 2  ;;  %s585_s17 = sshll.u32 %s343_s27, 4  ;;  %s583_s6 = scalar_lea.hbm %s1358_s4, %s752_s21  ;;  %s586_s17 = int_to_ptr.vmem [resolvable:$true] %s585_s17 }
  0x69   : > { %847 = vset.pattern.permute.xlu1 %v1079_v4  ;;  %v424_v37 = vrot.slane %v422_v35, 2  ;;  %v351_v4 = vld [vmem:[%s1275_s12 + $0x18] sm:$0xff]  ;;  %s571_s11 = scalar_lea.sflag [#allocation4], %s1254_s5  ;;  %s982_s1 = scalar_lea.vmem %s586_s17, 128 }
  0x6a   : > { %504 = vperm.xlu1 %847, %v344_v2   ;;  %v385_v30 = vmul.f32 1.442695, %v383_v28  ;;  %v387_v31 = vmul.f32 1.442695, %v384_v29  ;;  %v420_v38 = vsub.f32 %v345_v32, %v418_v36  ;;  %v421_v39 = vadd.f32 %v418_v36, %v345_v32  ;;  %p983_p8 = scmp.ne.s32.totalorder %s586_s17, %s982_s1  ;;  %s1087_s29 = smov [#allocation10]  }
  0x6b   : > { %v426_v40 = vsub.f32 %v1293_v33, %v424_v37  ;;  %v427_v41 = vadd.f32 %v424_v37, %v1293_v33  ;;  %v378_v14 = vmul.f32 %v351_v4, %v1287_v25  ;;  %s986_s8 = sshll.u32 %s1087_s29, 4  ;;  %s987_s8 = int_to_ptr.vmem [resolvable:$false] %s986_s8 }
  0x6c   : > { %v428_v48 = vsub.f32 %v421_v39, %v420_v38  ;;  %p984_p0 = pnand %p983_p8, %p1168_p9  ;;  %s988_s18 = scalar_lea.vmem %s987_s8, 256 }
  0x6d   : > { %v438_v44 = vmin.f32 %v421_v39, %v427_v41  ;;  %v439_v45 = vmax.f32 %v420_v38, %v426_v40  ;;  %v433_v49 = vsub.f32 %v427_v41, %v426_v40  ;;  %v450_v51 = vmax.f32 %v421_v39, %v427_v41  ;;  %p989_p3 = scmp.lt.s32.totalorder %s586_s17, %s987_s8  ;;  %p990_p4 = scmp.lt.s32.totalorder %s988_s18, %s982_s1 }
  0x6e   : > { %848 = vset.pattern.permute.xlu1 %v1080_v5  ;;  %v451_v52 = vmin.f32 %v420_v38, %v426_v40  ;;  %v430_v53 = vrot.slane %v428_v48, 1  ;;  %v471_v40 = vlaneseq  ;;  %p985_p1 = pneg %p984_p0 }
  0x6f   : > { %515 = vperm.xlu1 %848, %v344_v2   ;;  %v440_v50 = vsub.f32 %v438_v44, %v439_v45  ;;  %v435_v54 = vrot.slane %v433_v49, 1  ;;  %p991_p5 = por %p990_p4, %p989_p3 }
  0x70   : > { %v452_v56 = vsub.f32 %v450_v51, %v451_v52  ;;  %v432_v57 = vmul.f32 %v430_v53, %v428_v48  ;;  %v482_v44 = vshrl.u32 %v471_v40, 7 }
  0x71   : > { %v441_v55 = vmax.f32 %v440_v50, 0.0  ;;  %v437_v58 = vmul.f32 %v435_v54, %v433_v49  ;;  %v472_v50 = vand.u32 127, %v471_v40  ;;  %p992_p6 = pnand %p991_p5, %p985_p1 }
  0x72   : > { %v454_v60 = vrot.slane %v452_v56, 1  ;;  %v489_v51 = vsub.s32 1, %v482_v44  ;;  %v509_v54 = vsub.s32 2, %v482_v44 }
  0x73   : > { %849 = vset.pattern.permute.xlu1 %v1081_v6  ;;  %v443_v59 = vrot.slane %v441_v55, 1  ;;  %vm473_vm4 = vcmp.ge.s32.totalorder %v472_v50, 8 }
  0x74   : > { %526 = vperm.xlu1 %849, %v344_v2   ;;  %v456_v1 = vmul.f32 %v454_v60, %v452_v56  ;;  %v520_v60 = vsub.s32 3, %v482_v44 }
  0x75   : > { %v445_v63 = vmul.f32 %v443_v59, %v441_v55 }
  0x78   : > { %850 = vset.pattern.permute.xlu1 %v1082_v7 }
  0x79   : > { %537 = vperm.xlu1 %850, %v344_v2  }
  0x7d   : > { %851 = vset.pattern.permute.xlu1 %v1083_v8 }
  0x7e   : > { %548 = vperm.xlu1 %851, %v344_v2  }
  0x82   : > { %852 = vset.pattern.permute.xlu1 %v1085_v15 }
  0xee   : > { %v355_v9 = vpop.xlane.xlu0 %354 }
  0xef   : > { %v356_v10 = vsub.f32 %v347_v0, %v355_v9 }
  0xf1   : > { %v357_v11 = vmul.f32 1.442695, %v356_v10 }
  0xf3   : > { %854 = vpow2.f32 %v357_v11  ;;  %v375_v11 = vmax.f32 %v1284_v24, 0.0 }
 0x100   : > { %v855_v12 = vpop.eup %854 }
 0x101   : > { %v359_v13 = vsel %vm352_vm0, %v855_v12, 0.0  ;;  %v376_v12 = vmax.f32 %v1287_v25, 0.0 }
 0x102   : > { %360 = vadd.xlane.f32.xlu0 %v359_v13  ;;  %v377_v13 = vmul.f32 %v350_v3, %v1284_v24 }
 0x118   : > { %493 = vperm.xlu0 %846, %v344_v2  }
 0x11c   : > { %853 = vset.pattern.permute.xlu0 %v1085_v15 }
 0x18b   : > { %v361_v16 = vpop.xlane.xlu0 %360 }
 0x18c   : > { %856 = vlog2.f32 %v361_v16 }
 0x18d   : > { %858 = vpow2.f32 %v385_v30 }
 0x18e   : > { %860 = vpow2.f32 %v387_v31 }
 0x193   : > { %v494_v59 = vpop.permute.xlu0 %493 }
 0x199   : > { %v857_v17 = vpop.eup %856 }
 0x19a   : > { %v363_v18 = vmul.f32 0.6931472, %v857_v17  ;;  %v859_v42 = vpop.eup %858 }
 0x19b   : > { %v861_v43 = vpop.eup %860  ;;  %v389_v46 = vadd.f32 1.0, %v859_v42  ;;  %v392_v61 = vmul.f32 -0.5, %v859_v42  ;;  %v395_v8 = vand.u32 2147483647, %v859_v42 }
 0x19c   : > { %v364_v19 = vadd.f32 %v363_v18, %v355_v9  ;;  %v398_v47 = vadd.f32 1.0, %v861_v43  ;;  %v401_v62 = vmul.f32 -0.5, %v861_v43  ;;  %v404_v9 = vand.u32 2147483647, %v861_v43 }
 0x19d   : > { %862 = vlog2.f32 %v389_v46  ;;  %v393_v5 = vadd.f32 1.0, %v392_v61  ;;  %vm396_vm2 = vcmp.lt.f32.partialorder %v395_v8, 0.0004427343 }
 0x19e   : > { %v365_v20 = vsub.f32 %v347_v0, %v364_v19  ;;  %864 = vlog2.f32 %v398_v47  ;;  %v402_v6 = vadd.f32 1.0, %v401_v62  ;;  %vm405_vm3 = vcmp.lt.f32.partialorder %v404_v9, 0.0004427343  ;;  %v479_v19 = vpop.permute.xlu1 %478 }
 0x19f   : > { %866 = vrcp.f32 %v456_v1  ;;  %v394_v16 = vmul.f32 %v859_v42, %v393_v5  ;;  %v483_v47 = vsub.s32 0, %v482_v44  ;;  %v510_v62 = vrot.slane %v1293_v33, %v509_v54 }
 0x1a0   : > { %v367_v21 = vrot.slane %v365_v20, 7  ;;  %v403_v18 = vmul.f32 %v861_v43, %v402_v6  ;;  %v379_v20 = vsub.f32 %v375_v11, %v377_v13  ;;  %v521_v5 = vrot.slane %v1293_v33, %v520_v60 }
 0x1a1   : > { %v484_v53 = vrot.slane %v1293_v33, %v483_v47  ;;  %v542_v6 = vsub.s32 5, %v482_v44 }
 0x1a2   : > { %v369_v22 = vmul.f32 %v367_v21, %v347_v0  ;;  %v446_v0 = vadd.f32 %v437_v58, %v432_v57  ;;  %v380_v21 = vsub.f32 %v376_v12, %v378_v14  ;;  %v505_v28 = vpop.permute.xlu1 %504  ;;  %v499_v58 = vrot.slane %v1293_v33, %v489_v51 }
 0x1a3   : > { %v511_v8 = vsub.f32 %v505_v28, %v510_v62  ;;  %v564_v14 = vsub.s32 7, %v482_v44 }
 0x1a4   : > { %v371_v23 = vsel %vm370_vm1, %v369_v22, 0.0  ;;  %v447_v10 = vsub.f32 %v446_v0, %v445_v63  ;;  %v1086_v0 = vmov 0.0   ;;  %v500_v4 = vsub.f32 %v494_v59, %v499_v58 }
 0x1a5   : > { %372 = vadd.xlane.f32.xlu1 %v371_v23 }
 0x1a6   : > { %868 = vrcp.f32 %v447_v10  ;;  %v457_v30 = vsub.f32 %v456_v1, %v447_v10  ;;  %v516_v31 = vpop.permute.xlu1 %515  ;;  %v474_v1 = vsel %vm473_vm4, 1e+30, %v1086_v0  ;;  %v553_v10 = vsub.s32 6, %v482_v44 }
 0x1a7   : > { %v501_v13 = vand.u32 2147483647, %v500_v4 }
 0x1aa   : > { %v527_v37 = vpop.permute.xlu1 %526 }
 0x1ae   : > { %v538_v42 = vpop.permute.xlu1 %537 }
 0x1b2   : > { %v549_v48 = vpop.permute.xlu1 %548 }
 0x1b6   : > { %559 = vperm.xlu1 %852, %v344_v2   ;;  %v863_v2 = vpop.eup %862 }
 0x1b7   : > { %v865_v7 = vpop.eup %864  ;;  %v391_v15 = vmul.f32 0.6931472, %v863_v2  ;;  %v485_v2 = vsub.f32 %v479_v19, %v484_v53  ;;  %v512_v19 = vand.u32 2147483647, %v511_v8 }
 0x1b8   : > { %v400_v17 = vmul.f32 0.6931472, %v865_v7  ;;  %v867_v24 = vpop.eup %866 }
 0x1b9   : > { %v397_v22 = vsel %vm396_vm2, %v394_v16, %v391_v15  ;;  %v869_v25 = vpop.eup %868  ;;  %v459_v35 = vmul.f32 %v867_v24, %v457_v30  ;;  %v486_v11 = vand.u32 2147483647, %v485_v2  ;;  %v522_v15 = vsub.f32 %v516_v31, %v521_v5 }
 0x1ba   : > { %v406_v23 = vsel %vm405_vm3, %v403_v18, %v400_v17  ;;  %v407_v26 = vadd.f32 %v397_v22, %v379_v20  ;;  %v449_v34 = vmul.f32 %v869_v25, %v445_v63  ;;  %v531_v63 = vsub.s32 4, %v482_v44 }
 0x1bb   : > { %v408_v27 = vadd.f32 %v406_v23, %v380_v21  ;;  %v543_v16 = vrot.slane %v1293_v33, %v542_v6  ;;  %v554_v18 = vrot.slane %v1293_v33, %v553_v10  ;;  %v565_v22 = vrot.slane %v1293_v33, %v564_v14 }
 0x1bc   : > { %v460_v38 = vsub.f32 %v449_v34, %v459_v35  ;;  %v532_v9 = vrot.slane %v1293_v33, %v531_v63 }
 0x1bd   : > { %v409_v29 = vadd.f32 %v408_v27, %v407_v26  ;;  %v523_v26 = vand.u32 2147483647, %v522_v15  ;;  %v544_v27 = vsub.f32 %v538_v42, %v543_v16  ;;  %v555_v24 = vsub.f32 %v549_v48, %v554_v18 }
 0x1be   : > { %v461_v41 = vsub.f32 1.0, %v460_v38  ;;  %v533_v20 = vsub.f32 %v527_v37, %v532_v9 }
 0x1bf   : > { %v410_v32 = vrot.slane %v409_v29, 4  ;;  %v545_v31 = vand.u32 2147483647, %v544_v27  ;;  %v556_v34 = vand.u32 2147483647, %v555_v24 }
 0x1c0   : > { %v463_v45 = vrot.slane %v461_v41, 4 }
 0x1c1   : > { %v411_v36 = vadd.f32 %v410_v32, %v409_v29  ;;  %v534_v29 = vand.u32 2147483647, %v533_v20 }
 0x1c2   : > { %v465_v49 = vadd.f32 %v463_v45, %v461_v41 }
 0x1c3   : > { %v412_v39 = vrot.slane %v411_v36, 2 }
 0x1c4   : > { %v468_v56 = vrot.slane %v465_v49, 7 }
 0x1c5   : > { %v413_v43 = vadd.f32 %v412_v39, %v411_v36 }
 0x1c7   : > { %v414_v46 = vrot.slane %v413_v43, 1 }
 0x1c9   : > { %v415_v52 = vadd.f32 %v414_v46, %v413_v43 }
 0x22e   : > { %v373_v55 = vpop.xlane.xlu1 %372 }
 0x22f   : > { %v374_v57 = vsub.f32 0.0, %v373_v55 }
 0x231   : > { %v466_v61 = vadd.f32 %v415_v52, %v374_v57 }
 0x232   : > { %v560_v23 = vpop.permute.xlu1 %559 }
 0x233   : > { %v470_v3 = vadd.f32 %v468_v56, %v466_v61  ;;  %v566_v25 = vsub.f32 %v560_v23, %v565_v22 }
 0x235   : > { %v475_v7 = vadd.f32 %v474_v1, %v470_v3  ;;  %v567_v36 = vand.u32 2147483647, %v566_v25 }
 0x237   : > { %v490_v12 = vrot.slane %v475_v7, %v489_v51 }
 0x239   : > { %v491_v17 = vadd.f32 %v490_v12, %v486_v11 }
 0x23b   : > { %v502_v21 = vadd.f32 %v501_v13, %v491_v17 }
 0x23d   : > { %v513_v28 = vadd.f32 %v512_v19, %v502_v21 }
 0x23f   : > { %v524_v30 = vadd.f32 %v523_v26, %v513_v28 }
 0x241   : > { %v535_v32 = vadd.f32 %v534_v29, %v524_v30 }
 0x243   : > { %v546_v35 = vadd.f32 %v545_v31, %v535_v32 }
 0x245   : > { %v557_v33 = vadd.f32 %v556_v34, %v546_v35 }
 0x247   : > { %v568_v37 = vadd.f32 %v567_v36, %v557_v33 }
 0x249   : > { %569 = vst [vmem:[%s343_s27] sm:$0xff] %v568_v37 }
 0x24a   : > { %995 = shalt.err (!%p992_p6)
}
 0x24b   : > { %s996_s14 = scalar_lea.hbm %s583_s6, 128  ;;  %s1000_s24 = scalar_lea.hbm %s1358_s4, 256 }
 0x24c   : > { %p997_p7 = scmp.ne.s32.totalorder %s583_s6, %s996_s14  ;;  %p1001_p2 = scmp.lt.s32.totalorder %s583_s6, %s1358_s4 }
 0x24d   : > { %p1002_p8 = scmp.lt.s32.totalorder %s1000_s24, %s996_s14 }
 0x24e   : > { %p998_p10 = pnand %p997_p7, %p1168_p9 }
 0x24f   : > { %p1003_p0 = por %p1002_p8, %p1001_p2 }
 0x250   : > { %p999_p13 = pneg %p998_p10 }
 0x252   : > { %p1004_p12 = pnand %p1003_p0, %p999_p13 }
 0x254   : > { %1007 = shalt.err (!%p1004_p12)
}
 0x255   : > { %765 = dma.vmem_to_hbm [thread:$0]  (%p1168_p9), %s586_s17, 128, %s583_s6, %s571_s11  }
 0x256 PF: > { %s597_s10 = sand.u32 1, %s1050_s15   ;;  %p1376_p1 = scmp.ge.s32.totalorder %s1070_s20, 2 }
 0x257   : > { %s598_s13 = scalar_lea.sflag [#allocation4], %s597_s10 }
 0x258   : > { %p781_p3 = pnand %p1376_p1, %p1175_p11 }
 0x25a   : > { %p782_p4 = pneg %p781_p3 }
 0x25c   : > { %1045 = dma.done.wait (%p782_p4), %s598_s13, 128  }
 0x25d   : > { %1047 = vsyncadd (%p782_p4), %s598_s13, 4294967168  ;;  %s26_s20 = sadd.s32 1, %s1070_s20   ;;  %s1377_s25 = sld [smem:[#allocation15_spill]] }
 0x25e   : > { %p23_p5 = scmp.ge.s32.totalorder %s26_s20, 4   ;;  %s1378_s17 = sld [smem:[#allocation17_spill]] }
 0x25f   : > { %s1379_s28 = sld [smem:[#allocation16_spill]]  ;;  %s1380_s15 = smov %s1054_s16 }
 0x260   : > { %s1382_s18 = smov %s1066_s19 }
 0x261   :  { %25 = sbr.rel (!%p23_p5) target bundleno = 12 (0xc), region = 118 }
 0x263   : > { %s1381_s16 = smov %s1377_s25 }
 0x265   : > { %s1383_s19 = smov %s1379_s28 }
 0x266   :  { %603 = vsyncpa [#allocation3], 1 }
 0x267   :  { %605 = vsyncpa [#allocation3 + $0x1], 1 }
 0x268   :  { %606 = vsyncpa [#allocation6], 1 }
 0x269   :  { %608 = vsyncpa [#allocation6 + $0x1], 1 }
 0x26a   :  { %609 = vsyncpa [#allocation9], 1 }
 0x26b   :  { %611 = vsyncpa [#allocation9 + $0x1], 1 }
 0x26c   :  { %612 = vsyncpa [#allocation4], 1 }
 0x26d   :  { %614 = vsyncpa [#allocation4 + $0x1], 1 }

</bundles_post_ra>
